<compile_context>
chip_gen: v7x
topology: tpu7x:2x2x1
jax: 0.10.0
libtpu: 0.0.40
codegen_flags: <defaults>
</compile_context>

<pallas_src>
import jax
import jax.numpy as jnp
from jax import lax
from jax.experimental import pallas as pl
from jax.experimental.pallas import tpu as pltpu


_LANE = 128                     # lane width of the flattened 2-D view
_ACC_ROWS = 64                  # accumulator sublanes (breaks serial VALU add chain)
_TARGET_TILE_BYTES = 4 << 20    # per-input, per-buffer DMA tile (~4 MiB)
_MAX_TILE_ROWS = 8192           # caps per-value f32 temporary footprint at 4 MiB


def _cdiv(a, b):
    return -(-a // b)


def _round_up(x, m):
    return _cdiv(x, m) * m


def _round_down(x, m):
    return (x // m) * m


def _num_core_splits():
    """2 on multi-TensorCore-per-chip parts (v7x), else 1 (v5e/v6e)."""
    try:
        kind = jax.devices()[0].device_kind.lower()
    except Exception:
        return 1
    return 2 if "7" in kind else 1


def _make_kernel(*, rows, tile_rows, acc_rows, steps, needs_mask):
    """Kernel: accumulate sum((a-b)^2) into an output-resident (acc_rows, 128) block."""

    def kernel(a_ref, b_ref, o_ref):
        j = pl.program_id(1)

        @pl.when(j == 0)
        def _init():
            o_ref[...] = jnp.zeros_like(o_ref)

        d = a_ref[...].astype(jnp.float32) - b_ref[...].astype(jnp.float32)
        sq = d * d

        def _accumulate(x):
            if tile_rows == acc_rows:
                o_ref[...] += x
            else:
                # (tile_rows, 128) -> (tile_rows//acc_rows, acc_rows, 128) is a pure
                # vreg regrouping; the axis-0 sum is elementwise VPU adds over
                # acc_rows//8 independent accumulation chains (hidden under DMA).
                o_ref[...] += x.reshape(-1, acc_rows, _LANE).sum(axis=0)

        if not needs_mask:
            _accumulate(sq)
        else:
            p = pl.program_id(0)
            start = (p * steps + j) * tile_rows      # logical (unclamped) row offset
            is_edge = start + tile_rows > rows       # only the tail block(s)

            @pl.when(jnp.logical_not(is_edge))
            def _full():
                _accumulate(sq)

            @pl.when(is_edge)
            def _tail():
                # Rows past `rows` hold undefined VMEM data (partial / clamped
                # DMA) -- they MUST be zeroed before accumulation.
                row_id = lax.broadcasted_iota(jnp.int32, (tile_rows, _LANE), 0)
                valid = (row_id + start) < rows
                _accumulate(jnp.where(valid, sq, 0.0))

    return kernel


def frobenius_loss(a, b):
    """Pallas TPU implementation of FrobeniusLoss.forward(a, b) -> scalar."""
    assert a.shape == b.shape and a.ndim == 3, "expected (B, M, N) inputs"
    assert not jnp.issubdtype(a.dtype, jnp.complexfloating), "complex inputs unsupported"
    B = a.shape[0]
    total = a.size
    itemsize = jnp.dtype(a.dtype).itemsize

    # Flatten to a lane-dense (rows, 128) view. Only the sub-128 remainder is
    # ever padded (< 1 row); the bulk of the data is never copied.
    a_flat = a.reshape(-1)
    b_flat = b.reshape(-1)
    rem = total % _LANE
    if rem:
        pad = _LANE - rem
        a_flat = jnp.pad(a_flat, (0, pad))   # (0-0)^2 contributes nothing
        b_flat = jnp.pad(b_flat, (0, pad))
    rows = a_flat.size // _LANE
    a2 = a_flat.reshape(rows, _LANE)
    b2 = b_flat.reshape(rows, _LANE)

    # Leading split axis: only worth it on multi-TC chips and non-trivial sizes.
    num_splits = _num_core_splits() if rows >= 2 * _ACC_ROWS else 1

    if rows >= _ACC_ROWS:
        # dtype-aware tile sizing, rounded to a 64-row granularity (a multiple of
        # the 8/16/32 sublane packing for f32/bf16/int8) and never larger than
        # the array itself (the last block may be partial; it gets masked).
        max_tile_rows = max(
            _ACC_ROWS,
            _round_down(min(_MAX_TILE_ROWS, _TARGET_TILE_BYTES // (_LANE * itemsize)),
                        _ACC_ROWS))
        tile_rows = min(max_tile_rows,
                        _round_up(_cdiv(rows, num_splits), _ACC_ROWS),
                        _round_down(rows, _ACC_ROWS))
        acc_rows = _ACC_ROWS
    else:
        # Tiny input: one full-extent block (legal even when rows % 8 != 0).
        num_splits = 1
        tile_rows = rows
        acc_rows = rows

    num_blocks = _cdiv(rows, tile_rows)
    steps = _cdiv(num_blocks, num_splits)
    # Static facts: does any block overhang the array / overshoot the block count?
    needs_mask = num_splits * steps * tile_rows > rows
    needs_clamp = num_splits * steps > num_blocks

    def in_map(p, j):
        l = p * steps + j
        if needs_clamp:
            # Overshoot blocks re-read the last valid block; their contribution
            # is zeroed by the in-kernel mask (which uses the unclamped index).
            l = jnp.minimum(l, num_blocks - 1)
        return (l, 0)

    kernel = _make_kernel(rows=rows, tile_rows=tile_rows, acc_rows=acc_rows,
                          steps=steps, needs_mask=needs_mask)

    # VMEM budget: 2 inputs x 2 pipeline buffers + f32 temporaries + outputs.
    tile_in_bytes = tile_rows * _LANE * itemsize
    tile_f32_bytes = tile_rows * _LANE * 4
    out_bytes = num_splits * acc_rows * _LANE * 4
    vmem_limit = 2 * 2 * tile_in_bytes + 6 * tile_f32_bytes + 2 * out_bytes + (2 << 20)
    vmem_limit = int(min(max(vmem_limit, 16 << 20), 56 << 20))   # <= 56 MiB (v7x safe)

    partials = pl.pallas_call(
        kernel,
        out_shape=jax.ShapeDtypeStruct((num_splits * acc_rows, _LANE), jnp.float32),
        grid_spec=pltpu.PrefetchScalarGridSpec(
            num_scalar_prefetch=0,
            grid=(num_splits, steps),
            in_specs=[
                pl.BlockSpec((tile_rows, _LANE), in_map),
                pl.BlockSpec((tile_rows, _LANE), in_map),
            ],
            out_specs=pl.BlockSpec((acc_rows, _LANE), lambda p, j: (p, 0)),
        ),
        compiler_params=pltpu.CompilerParams(
            dimension_semantics=("parallel", "arbitrary"),
            vmem_limit_bytes=vmem_limit,
        ),
    )(a2, b2)

    # Final tiny reduce + mean over the TRUE batch size (not the grid extent).
    return jnp.sum(partials) / B


def _reference(a, b):
    loss = jnp.sum(jnp.abs(a - b) ** 2, axis=(1, 2))
    return jnp.mean(loss)


if __name__ == "__main__":
    key = jax.random.PRNGKey(0)
    k1, k2 = jax.random.split(key)

    # Small shape consistent with the module's (B, M, N) forward.
    B, M, N = 2, 16, 16
    a = jax.random.normal(k1, (B, M, N), dtype=jnp.float32)
    b = jax.random.normal(k2, (B, M, N), dtype=jnp.float32)
    out = frobenius_loss(a, b)
    jax.block_until_ready(out)
    ref = _reference(a, b)
    assert jnp.allclose(out, ref, rtol=1e-5, atol=1e-5), (out, ref)

    # Non-128-aligned shape: exercises the tiny lane-tail pad + full-extent block.
    k3, k4 = jax.random.split(k2)
    a2 = jax.random.normal(k3, (3, 20, 37), dtype=jnp.float32)
    b2 = jax.random.normal(k4, (3, 20, 37), dtype=jnp.float32)
    out2 = frobenius_loss(a2, b2)
    jax.block_until_ready(out2)
    ref2 = _reference(a2, b2)
    assert jnp.allclose(out2, ref2, rtol=1e-5, atol=1e-4), (out2, ref2)

    # Larger ragged shape: exercises the in-kernel tail-mask (partial last block).
    k5, k6 = jax.random.split(k4)
    a3 = jax.random.normal(k5, (2, 70, 100), dtype=jnp.float32)
    b3 = jax.random.normal(k6, (2, 70, 100), dtype=jnp.float32)
    out3 = frobenius_loss(a3, b3)
    jax.block_until_ready(out3)
    ref3 = _reference(a3, b3)
    assert jnp.allclose(out3, ref3, rtol=1e-5, atol=1e-3), (out3, ref3)

    print("KERNEL_OK")
</pallas_src>

<mosaic_0001>
module attributes {stable_mosaic.version = 11 : i64} {
  func.func @kernel(%arg0: i32, %arg1: i32, %arg2: memref<4x128xf32, #tpu.memory_space<vmem>>, %arg3: memref<4x128xf32, #tpu.memory_space<vmem>>, %arg4: memref<4x128xf32, #tpu.memory_space<vmem>>) attributes {dimension_semantics = [#tpu.dimension_semantics<parallel>, #tpu.dimension_semantics<arbitrary>], iteration_bounds = array<i64: 1, 1>, scalar_prefetch = 0 : i64, scratch_operands = 0 : i64, tpu.core_type = #tpu.core_type<tc>, window_params = [{transform_indices = @transform_0, window_bounds = array<i64: 4, 128>}, {transform_indices = @transform_1, window_bounds = array<i64: 4, 128>}, {transform_indices = @transform_2, window_bounds = array<i64: 4, 128>}]} {
    %c0_i32 = arith.constant 0 : i32
    %0 = arith.cmpi eq, %arg1, %c0_i32 : i32
    %1 = arith.extui %0 : i1 to i32
    %c0_i32_0 = arith.constant 0 : i32
    %2 = arith.cmpi ne, %1, %c0_i32_0 : i32
    scf.if %2 {
      %cst = arith.constant 0.000000e+00 : f32
      %10 = vector.broadcast %cst : f32 to vector<4x128xf32>
      %c0_8 = arith.constant 0 : index
      %c0_9 = arith.constant 0 : index
      %11 = vector.load %arg4[%c0_8, %c0_9] : memref<4x128xf32, #tpu.memory_space<vmem>>, vector<4x128xf32>
      tpu.vector_store %arg4[%c0_8, %c0_9], %10 {strides = array<i32>} : memref<4x128xf32, #tpu.memory_space<vmem>>, vector<4x128xf32>,
    } else {
    }
    %c0 = arith.constant 0 : index
    %c0_1 = arith.constant 0 : index
    %3 = vector.load %arg2[%c0, %c0_1] : memref<4x128xf32, #tpu.memory_space<vmem>>, vector<4x128xf32>
    %c0_2 = arith.constant 0 : index
    %c0_3 = arith.constant 0 : index
    %4 = vector.load %arg3[%c0_2, %c0_3] : memref<4x128xf32, #tpu.memory_space<vmem>>, vector<4x128xf32>
    %5 = arith.subf %3, %4 : vector<4x128xf32>
    %6 = arith.mulf %5, %5 : vector<4x128xf32>
    %c0_4 = arith.constant 0 : index
    %c0_5 = arith.constant 0 : index
    %7 = vector.load %arg4[%c0_4, %c0_5] : memref<4x128xf32, #tpu.memory_space<vmem>>, vector<4x128xf32>
    %8 = arith.addf %7, %6 : vector<4x128xf32>
    %c0_6 = arith.constant 0 : index
    %c0_7 = arith.constant 0 : index
    %9 = vector.load %arg4[%c0_6, %c0_7] : memref<4x128xf32, #tpu.memory_space<vmem>>, vector<4x128xf32>
    tpu.vector_store %arg4[%c0_6, %c0_7], %8 {strides = array<i32>} : memref<4x128xf32, #tpu.memory_space<vmem>>, vector<4x128xf32>,
    return
  }
  func.func @transform_0(%arg0: i32, %arg1: i32) -> (i32, i32) {
    %c1_i32 = arith.constant 1 : i32
    %0 = arith.muli %arg0, %c1_i32 : i32
    %1 = arith.addi %0, %arg1 : i32
    %c0_i32 = arith.constant 0 : i32
    %c0_i32_0 = arith.constant 0 : i32
    return %1, %c0_i32 : i32, i32
  }
  func.func @transform_1(%arg0: i32, %arg1: i32) -> (i32, i32) {
    %c1_i32 = arith.constant 1 : i32
    %0 = arith.muli %arg0, %c1_i32 : i32
    %1 = arith.addi %0, %arg1 : i32
    %c0_i32 = arith.constant 0 : i32
    %c0_i32_0 = arith.constant 0 : i32
    return %1, %c0_i32 : i32, i32
  }
  func.func @transform_2(%arg0: i32, %arg1: i32) -> (i32, i32) {
    %c0_i32 = arith.constant 0 : i32
    %c0_i32_0 = arith.constant 0 : i32
    return %arg0, %c0_i32 : i32, i32
  }
}

</mosaic_0001>

<bundles_post_ra>
// kernel: tpu_custom_call.1
= control target key start
LH: loop header
LB: loop body
LE: loop exit
PB: predicated region body
PF: predicated region fallthrough
CT: control target
= control target key end

     0   :  { %7 = vsyncpa [#allocation3], 0  ;;  %s203_s0 = inlined_call_operand.hbm [shape: f32[4,128], index: 0, kind: input, shape index: {}]   ;;  %s204_s1 = inlined_call_operand.hbm [shape: f32[4,128], index: 1, kind: input, shape index: {}]   ;;  %s205_s2 = inlined_call_operand.hbm [shape: f32[4,128], index: 2, kind: output, shape index: {}]  }
   0x1   :  { %8 = vsyncpa [#allocation6], 0 }
   0x2   :  { %9 = vsyncpa [#allocation4], 0  ;;  %s148_s9 = smov [#allocation2]   ;;  %s149_s11 = smov [#allocation5]  }
   0x3   :  { %s19_s10 = sshll.u32 %s148_s9, 4  ;;  %s32_s12 = sshll.u32 %s149_s11, 4  ;;  %s20_s10 = int_to_ptr.vmem [resolvable:$true] %s19_s10  ;;  %s33_s12 = int_to_ptr.vmem [resolvable:$true] %s32_s12 }
   0x4   :  { %s76_s15 = scalar_lea.hbm %s203_s0, 64 }
   0x5   :  { %p77_p0 = scmp.ne.s32.totalorder %s203_s0, %s76_s15  ;;  %p80_p1 = scmp.lt.u32.totalorder %s76_s15, %s203_s0 }
   0x7   :  { %p82_p2 = pnand %p80_p1, %p77_p0 }
   0x9   :  { %85 = shalt.err (!%p82_p2)
}
   0xa   :  { %s86_s20 = scalar_lea.vmem %s20_s10, 64  ;;  %p91_p4 = scmp.lt.s32.totalorder %s20_s10, %s20_s10 }
   0xb   :  { %p87_p3 = scmp.ne.s32.totalorder %s20_s10, %s86_s20  ;;  %p92_p5 = scmp.lt.s32.totalorder %s86_s20, %s86_s20 }
   0xd   :  { %p93_p6 = por %p92_p5, %p91_p4 }
   0xf   :  { %p94_p7 = pnand %p93_p6, %p87_p3 }
  0x11   :  { %97 = shalt.err (!%p94_p7)
}
  0x12   :  { %22 = dma.hbm_to_vmem [thread:$0]  %s203_s0, 64, %s20_s10, [#allocation3]  }
  0x13   :  { %s98_s25 = scalar_lea.hbm %s204_s1, 64 }
  0x14   :  { %p99_p8 = scmp.ne.s32.totalorder %s204_s1, %s98_s25  ;;  %p102_p9 = scmp.lt.u32.totalorder %s98_s25, %s204_s1 }
  0x16   :  { %p104_p10 = pnand %p102_p9, %p99_p8 }
  0x18   :  { %107 = shalt.err (!%p104_p10)
}
  0x19   :  { %s108_s30 = scalar_lea.vmem %s33_s12, 64  ;;  %p113_p12 = scmp.lt.s32.totalorder %s33_s12, %s33_s12 }
  0x1a   :  { %p109_p11 = scmp.ne.s32.totalorder %s33_s12, %s108_s30  ;;  %p114_p13 = scmp.lt.s32.totalorder %s108_s30, %s108_s30 }
  0x1c   :  { %p115_p0 = por %p114_p13, %p113_p12 }
  0x1e   :  { %p116_p1 = pnand %p115_p0, %p109_p11 }
  0x20   :  { %119 = shalt.err (!%p116_p1)
}
  0x21   :  { %35 = dma.hbm_to_vmem [thread:$0]  %s204_s1, 64, %s33_s12, [#allocation6]  }
  0x22   :  { %142 = dma.done.wait [#allocation3], 64  }
  0x23   :  { %143 = vsyncadd [#allocation3], 4294967232 }
  0x24   :  { %144 = dma.done.wait [#allocation6], 64  }
  0x25   :  { %145 = vsyncadd [#allocation6], 4294967232  ;;  %v150_v0 = vmov 0.0   ;;  %v49_v1 = vld [vmem:[#allocation2] sm:$0xf]  ;;  %s151_s4 = smov [#allocation7]  }
  0x26   :  { %48 = vst [vmem:[#allocation7] sm:$0xf] %v150_v0  ;;  %v50_v2 = vld [vmem:[#allocation5] sm:$0xf]  ;;  %s62_s5 = sshll.u32 %s151_s4, 4  ;;  %s63_s5 = int_to_ptr.vmem [resolvable:$true] %s62_s5 }
  0x27   :  { %v51_v3 = vsub.f32 %v49_v1, %v50_v2  ;;  %s120_s6 = scalar_lea.vmem %s63_s5, 64  ;;  %p125_p3 = scmp.lt.s32.totalorder %s63_s5, %s63_s5 }
  0x28   :  { %p121_p2 = scmp.ne.s32.totalorder %s63_s5, %s120_s6  ;;  %p126_p4 = scmp.lt.s32.totalorder %s120_s6, %s120_s6 }
  0x29   :  { %v52_v5 = vmul.f32 %v51_v3, %v51_v3 }
  0x2a   :  { %p127_p5 = por %p126_p4, %p125_p3 }
  0x2c   :  { %p128_p6 = pnand %p127_p5, %p121_p2 }
  0x2d   :  { %v53_v4 = vld [vmem:[#allocation7] sm:$0xf] }
  0x2e   :  { %v54_v6 = vadd.f32 %v53_v4, %v52_v5 }
  0x30   :  { %55 = vst [vmem:[#allocation7] sm:$0xf] %v54_v6 }
  0x31   :  { %131 = shalt.err (!%p128_p6)
}
  0x32   :  { %s132_s8 = scalar_lea.hbm %s205_s2, 64 }
  0x33   :  { %p133_p7 = scmp.ne.s32.totalorder %s205_s2, %s132_s8  ;;  %p136_p8 = scmp.lt.u32.totalorder %s132_s8, %s205_s2 }
  0x35   :  { %p138_p9 = pnand %p136_p8, %p133_p7 }
  0x37   :  { %141 = shalt.err (!%p138_p9)
}
  0x38   :  { %65 = dma.vmem_to_hbm [thread:$0]  %s63_s5, 64, %s205_s2, [#allocation4]  }
  0x39   :  { %146 = dma.done.wait [#allocation4], 64  }
  0x3a   :  { %147 = vsyncadd [#allocation4], 4294967232 }
  0x3b   :  { %69 = vsyncpa [#allocation3], 1 }
  0x3c   :  { %70 = vsyncpa [#allocation6], 1 }
  0x3d   :  { %71 = vsyncpa [#allocation4], 1 }

</bundles_post_ra>
